<compile_context>
chip_gen: v7x
topology: tpu7x:2x2x1
jax: 0.10.0
libtpu: 0.0.40
codegen_flags: <defaults>
</compile_context>

<pallas_src>
import math
import functools

import jax
import jax.numpy as jnp
from jax.experimental import pallas as pl
from jax.experimental.pallas import tpu as pltpu


# ---------------------------------------------------------------------------
# helpers
# ---------------------------------------------------------------------------
def _pick_tile(dim, preferred, align):
    """Largest aligned tile <= preferred that divides dim; else the full dim."""
    if dim <= preferred:
        return dim
    t = (preferred // align) * align
    while t >= align:
        if dim % t == 0:
            return t
        t -= align
    return dim


def _gelu_new(y):
    return 0.5 * y * (1.0 + jnp.tanh(math.sqrt(2.0 / math.pi)
                                     * (y + 0.044715 * (y ** 3))))


# ---------------------------------------------------------------------------
# LayerNorm kernel (row-tiled, reduction over hidden dim, bf16 output)
# ---------------------------------------------------------------------------
def _ln_kernel(x_ref, g_ref, b_ref, o_ref, *, eps):
    x = x_ref[...].astype(jnp.float32)
    mean = jnp.mean(x, axis=-1, keepdims=True)
    var = jnp.mean(jnp.square(x - mean), axis=-1, keepdims=True)
    y = (x - mean) * jax.lax.rsqrt(var + eps)
    y = y * g_ref[...].astype(jnp.float32) + b_ref[...].astype(jnp.float32)
    o_ref[...] = y.astype(o_ref.dtype)


def layernorm(x2d, g, b, eps, out_dtype, tm=256):
    M, D = x2d.shape
    tm = _pick_tile(M, tm, 8)
    g2 = g.reshape(1, D)
    b2 = b.reshape(1, D)
    return pl.pallas_call(
        functools.partial(_ln_kernel, eps=eps),
        out_shape=jax.ShapeDtypeStruct((M, D), out_dtype),
        grid=(M // tm,),
        in_specs=[
            pl.BlockSpec((tm, D), lambda i: (i, 0)),
            pl.BlockSpec((1, D), lambda i: (0, 0)),
            pl.BlockSpec((1, D), lambda i: (0, 0)),
        ],
        out_specs=pl.BlockSpec((tm, D), lambda i: (i, 0)),
        compiler_params=pltpu.CompilerParams(dimension_semantics=("parallel",)),
    )(x2d, g2, b2)


# ---------------------------------------------------------------------------
# Tiled matmul (GPT2 Conv1D: x @ w + b) with fused bias / gelu_new / residual
# ---------------------------------------------------------------------------
def _matmul_kernel(x_ref, w_ref, b_ref, o_ref, acc_ref, *, activation):
    k = pl.program_id(2)

    @pl.when(k == 0)
    def _():
        acc_ref[...] = jnp.zeros_like(acc_ref)

    acc_ref[...] += jnp.dot(x_ref[...], w_ref[...],
                            preferred_element_type=jnp.float32)

    @pl.when(k == pl.num_programs(2) - 1)
    def _():
        y = acc_ref[...] + b_ref[...].astype(jnp.float32)
        if activation == "gelu_new":
            y = _gelu_new(y)
        o_ref[...] = y.astype(o_ref.dtype)


def _matmul_residual_kernel(x_ref, w_ref, b_ref, r_ref, o_ref, acc_ref,
                            *, activation):
    k = pl.program_id(2)

    @pl.when(k == 0)
    def _():
        acc_ref[...] = jnp.zeros_like(acc_ref)

    acc_ref[...] += jnp.dot(x_ref[...], w_ref[...],
                            preferred_element_type=jnp.float32)

    @pl.when(k == pl.num_programs(2) - 1)
    def _():
        y = acc_ref[...] + b_ref[...].astype(jnp.float32)
        if activation == "gelu_new":
            y = _gelu_new(y)
        y = y + r_ref[...].astype(jnp.float32)
        o_ref[...] = y.astype(o_ref.dtype)


def matmul_bias(x2d, w, b, *, activation=None, residual=None, out_dtype=None,
                tm=256, tn=256, tk=512):
    M, K = x2d.shape
    _, N = w.shape
    out_dtype = out_dtype if out_dtype is not None else x2d.dtype
    tm = _pick_tile(M, tm, 8)
    tn = _pick_tile(N, tn, 128)
    tk = _pick_tile(K, tk, 128)
    grid = (M // tm, N // tn, K // tk)
    b2 = b.reshape(1, N)

    in_specs = [
        pl.BlockSpec((tm, tk), lambda i, j, k: (i, k)),
        pl.BlockSpec((tk, tn), lambda i, j, k: (k, j)),
        pl.BlockSpec((1, tn), lambda i, j, k: (0, j)),
    ]
    operands = [x2d, w, b2]
    if residual is not None:
        in_specs.append(pl.BlockSpec((tm, tn), lambda i, j, k: (i, j)))
        operands.append(residual)
        kernel = functools.partial(_matmul_residual_kernel, activation=activation)
    else:
        kernel = functools.partial(_matmul_kernel, activation=activation)

    return pl.pallas_call(
        kernel,
        out_shape=jax.ShapeDtypeStruct((M, N), out_dtype),
        grid=grid,
        in_specs=in_specs,
        out_specs=pl.BlockSpec((tm, tn), lambda i, j, k: (i, j)),
        scratch_shapes=[pltpu.VMEM((tm, tn), jnp.float32)],
        compiler_params=pltpu.CompilerParams(
            dimension_semantics=("parallel", "parallel", "arbitrary")),
    )(*operands)


# ---------------------------------------------------------------------------
# Flash-style causal self-attention (online softmax, blocked over KV)
# qkv tensor layout: (3, B, H, S, Dh)  -- slot 0=q, 1=k, 2=v
# ---------------------------------------------------------------------------
def _flash_attn_kernel(q_ref, k_ref, v_ref, mask_ref, o_ref,
                       m_sc, l_sc, acc_sc, *, scale, tq, tkv):
    qi = pl.program_id(2)
    kv = pl.program_id(3)

    @pl.when(kv == 0)
    def _():
        m_sc[...] = jnp.full_like(m_sc, -jnp.inf)
        l_sc[...] = jnp.zeros_like(l_sc)
        acc_sc[...] = jnp.zeros_like(acc_sc)

    # Skip KV blocks that lie entirely above the causal diagonal.
    @pl.when(kv * tkv <= qi * tq + (tq - 1))
    def _():
        q = q_ref[0, 0, 0]            # (tq, Dh)  bf16
        k = k_ref[0, 0, 0]            # (tkv, Dh) bf16
        v = v_ref[0, 0, 0]            # (tkv, Dh) bf16

        # scores: contract head_dim of both operands (no materialized k.T)
        s = jax.lax.dot_general(q, k, (((1,), (1,)), ((), ())),
                                preferred_element_type=jnp.float32) * scale
        s = s + mask_ref[0].astype(jnp.float32)          # additive padding mask
        row = qi * tq + jax.lax.broadcasted_iota(jnp.int32, (tq, tkv), 0)
        col = kv * tkv + jax.lax.broadcasted_iota(jnp.int32, (tq, tkv), 1)
        s = jnp.where(col <= row, s, -1e30)              # per-block causal mask

        m_prev = m_sc[...]
        m_new = jnp.maximum(m_prev, jnp.max(s, axis=-1, keepdims=True))
        alpha = jnp.exp(m_prev - m_new)
        p = jnp.exp(s - m_new)
        l_sc[...] = alpha * l_sc[...] + jnp.sum(p, axis=-1, keepdims=True)
        acc_sc[...] = alpha * acc_sc[...] + jax.lax.dot_general(
            p.astype(v.dtype), v, (((1,), (0,)), ((), ())),
            preferred_element_type=jnp.float32)
        m_sc[...] = m_new

    @pl.when(kv == pl.num_programs(3) - 1)
    def _():
        inv = pl.reciprocal(l_sc[...], approx=True)
        o_ref[0, 0] = (acc_sc[...] * inv).astype(o_ref.dtype)


def flash_attention(qkv, add_mask, *, tq=128, tkv=128):
    """qkv: (3, B, H, S, Dh); add_mask: (B, 1, S) additive f32. Returns (B,H,S,Dh)."""
    _, B, H, S, Dh = qkv.shape
    tq = _pick_tile(S, tq, 8)
    tkv = _pick_tile(S, tkv, 128)
    scale = 1.0 / math.sqrt(Dh)
    grid = (B, H, S // tq, S // tkv)
    kernel = functools.partial(_flash_attn_kernel, scale=scale, tq=tq, tkv=tkv)
    return pl.pallas_call(
        kernel,
        out_shape=jax.ShapeDtypeStruct((B, H, S, Dh), qkv.dtype),
        grid=grid,
        in_specs=[
            pl.BlockSpec((1, 1, 1, tq, Dh), lambda b, h, i, j: (0, b, h, i, 0)),
            pl.BlockSpec((1, 1, 1, tkv, Dh), lambda b, h, i, j: (1, b, h, j, 0)),
            pl.BlockSpec((1, 1, 1, tkv, Dh), lambda b, h, i, j: (2, b, h, j, 0)),
            pl.BlockSpec((1, 1, tkv), lambda b, h, i, j: (b, 0, j)),
        ],
        out_specs=pl.BlockSpec((1, 1, tq, Dh), lambda b, h, i, j: (b, h, i, 0)),
        scratch_shapes=[
            pltpu.VMEM((tq, 1), jnp.float32),    # running max m
            pltpu.VMEM((tq, 1), jnp.float32),    # running denom l
            pltpu.VMEM((tq, Dh), jnp.float32),   # running weighted sum
        ],
        compiler_params=pltpu.CompilerParams(
            dimension_semantics=("parallel", "parallel", "parallel", "arbitrary")),
    )(qkv, qkv, qkv, add_mask)


# ---------------------------------------------------------------------------
# Full transformer block forward
# ---------------------------------------------------------------------------
def transformer_block_forward(x, params, attention_mask=None):
    """x: (B, S, D) float32. Returns (hidden_states (B,S,D), present (2,B,H,S,Dh))."""
    B, S, D = x.shape
    H = params["num_heads"]
    Dh = D // H
    eps = params["ln_eps"]
    cdt = jnp.bfloat16   # MXU compute dtype (accumulation stays f32)

    # --- attention_mask preprocessing (same math as the PyTorch wrapper) ---
    if attention_mask is None:
        add_mask = jnp.zeros((B, 1, S), jnp.float32)
    else:
        add_mask = (1.0 - attention_mask.astype(jnp.float32))[:, None, :] * -10000.0

    x2d = x.reshape(B * S, D)

    # --- ln_1 + qkv projection (bf16 MXU, fused bias) ---
    h1 = layernorm(x2d, params["ln1_g"], params["ln1_b"], eps, out_dtype=cdt)
    qkv = matmul_bias(h1, params["c_attn_w"].astype(cdt), params["c_attn_b"],
                      out_dtype=cdt)                       # (B*S, 3D)

    # single reshape+transpose to head layout; k,v slices double as `present`
    qkv_t = qkv.reshape(B, S, 3, H, Dh).transpose(2, 0, 3, 1, 4)  # (3,B,H,S,Dh)
    present = qkv_t[1:3].astype(x.dtype)                   # (2, B, H, S, Dh)
    # TODO(synk): layer_past (KV-cache concat) not wired in this synthetic kernel.

    # --- blocked causal attention ---
    ctx = flash_attention(qkv_t, add_mask)                 # (B, H, S, Dh) bf16
    ctx2d = ctx.transpose(0, 2, 1, 3).reshape(B * S, D)    # merge heads

    # attention output projection + residual (fused in epilogue)
    attn_out = matmul_bias(ctx2d, params["attn_proj_w"].astype(cdt),
                           params["attn_proj_b"], residual=x2d,
                           out_dtype=x.dtype)              # (B*S, D) f32

    # --- ln_2 + MLP (gelu_new fused into c_fc epilogue, residual into c_proj) ---
    h2 = layernorm(attn_out, params["ln2_g"], params["ln2_b"], eps, out_dtype=cdt)
    ff = matmul_bias(h2, params["c_fc_w"].astype(cdt), params["c_fc_b"],
                     activation="gelu_new", out_dtype=cdt)
    out = matmul_bias(ff, params["mlp_proj_w"].astype(cdt), params["mlp_proj_b"],
                      residual=attn_out, out_dtype=x.dtype)

    return out.reshape(B, S, D), present


def init_params(key, hidden_size, num_heads, intermediate_size, eps=1e-5):
    D, I = hidden_size, intermediate_size
    keys = jax.random.split(key, 4)
    std = 0.02
    return {
        "num_heads": num_heads,
        "ln_eps": eps,
        "ln1_g": jnp.ones((D,), jnp.float32),
        "ln1_b": jnp.zeros((D,), jnp.float32),
        "c_attn_w": std * jax.random.normal(keys[0], (D, 3 * D), jnp.float32),
        "c_attn_b": jnp.zeros((3 * D,), jnp.float32),
        "attn_proj_w": std * jax.random.normal(keys[1], (D, D), jnp.float32),
        "attn_proj_b": jnp.zeros((D,), jnp.float32),
        "ln2_g": jnp.ones((D,), jnp.float32),
        "ln2_b": jnp.zeros((D,), jnp.float32),
        "c_fc_w": std * jax.random.normal(keys[2], (D, I), jnp.float32),
        "c_fc_b": jnp.zeros((I,), jnp.float32),
        "mlp_proj_w": std * jax.random.normal(keys[3], (I, D), jnp.float32),
        "mlp_proj_b": jnp.zeros((D,), jnp.float32),
    }


if __name__ == "__main__":
    B, S, D, H = 2, 8, 32, 4
    I = 4 * D

    key = jax.random.PRNGKey(0)
    kx, kp = jax.random.split(key)
    x = jax.random.normal(kx, (B, S, D), jnp.float32)
    # padding mask: mask out the last two tokens of batch element 1
    attention_mask = jnp.ones((B, S), jnp.float32).at[1, -2:].set(0.0)

    params = init_params(kp, D, H, I)

    hidden_states, present = transformer_block_forward(x, params, attention_mask)
    jax.block_until_ready((hidden_states, present))

    assert hidden_states.shape == (B, S, D)
    assert present.shape == (2, B, H, S, D // H)
    assert bool(jnp.all(jnp.isfinite(hidden_states)))
    print("KERNEL_OK")
</pallas_src>

<mosaic_0001>
module attributes {stable_mosaic.version = 11 : i64} {
  func.func @_ln_kernel(%arg0: i32, %arg1: memref<16x32xf32, #tpu.memory_space<vmem>>, %arg2: memref<1x32xf32, #tpu.memory_space<vmem>>, %arg3: memref<1x32xf32, #tpu.memory_space<vmem>>, %arg4: memref<16x32xbf16, #tpu.memory_space<vmem>>) attributes {dimension_semantics = [#tpu.dimension_semantics<parallel>], iteration_bounds = array<i64: 1>, scalar_prefetch = 0 : i64, scratch_operands = 0 : i64, tpu.core_type = #tpu.core_type<tc>, window_params = [{transform_indices = @transform_0, window_bounds = array<i64: 16, 32>}, {pipeline_mode = #tpu.pipeline_mode<synchronous>, transform_indices = @transform_1, window_bounds = array<i64: 1, 32>}, {pipeline_mode = #tpu.pipeline_mode<synchronous>, transform_indices = @transform_2, window_bounds = array<i64: 1, 32>}, {transform_indices = @transform_3, window_bounds = array<i64: 16, 32>}]} {
    %c0 = arith.constant 0 : index
    %c0_0 = arith.constant 0 : index
    %0 = vector.load %arg1[%c0, %c0_0] : memref<16x32xf32, #tpu.memory_space<vmem>>, vector<16x32xf32>
    %cst = arith.constant dense<0.000000e+00> : vector<16xf32>
    %1 = vector.multi_reduction <add>, %0, %cst [1] : vector<16x32xf32> to vector<16xf32>
    %2 = vector.shape_cast %1 : vector<16xf32> to vector<16x1xf32>
    %cst_1 = arith.constant 3.200000e+01 : f32
    %3 = vector.broadcast %cst_1 : f32 to vector<16x1xf32>
    %4 = arith.divf %2, %3 : vector<16x1xf32>
    %5 = vector.broadcast %4 : vector<16x1xf32> to vector<16x32xf32>
    %6 = arith.subf %0, %5 : vector<16x32xf32>
    %7 = arith.mulf %6, %6 : vector<16x32xf32>
    %cst_2 = arith.constant dense<0.000000e+00> : vector<16xf32>
    %8 = vector.multi_reduction <add>, %7, %cst_2 [1] : vector<16x32xf32> to vector<16xf32>
    %9 = vector.shape_cast %8 : vector<16xf32> to vector<16x1xf32>
    %cst_3 = arith.constant 3.200000e+01 : f32
    %10 = vector.broadcast %cst_3 : f32 to vector<16x1xf32>
    %11 = arith.divf %9, %10 : vector<16x1xf32>
    %12 = vector.broadcast %4 : vector<16x1xf32> to vector<16x32xf32>
    %13 = arith.subf %0, %12 : vector<16x32xf32>
    %cst_4 = arith.constant 9.99999974E-6 : f32
    %14 = vector.broadcast %cst_4 : f32 to vector<16x1xf32>
    %15 = arith.addf %11, %14 : vector<16x1xf32>
    %16 = math.rsqrt %15 : vector<16x1xf32>
    %17 = vector.broadcast %16 : vector<16x1xf32> to vector<16x32xf32>
    %18 = arith.mulf %13, %17 : vector<16x32xf32>
    %c0_5 = arith.constant 0 : index
    %c0_6 = arith.constant 0 : index
    %19 = vector.load %arg2[%c0_5, %c0_6] : memref<1x32xf32, #tpu.memory_space<vmem>>, vector<1x32xf32>
    %20 = vector.broadcast %19 : vector<1x32xf32> to vector<16x32xf32>
    %21 = arith.mulf %18, %20 : vector<16x32xf32>
    %c0_7 = arith.constant 0 : index
    %c0_8 = arith.constant 0 : index
    %22 = vector.load %arg3[%c0_7, %c0_8] : memref<1x32xf32, #tpu.memory_space<vmem>>, vector<1x32xf32>
    %23 = vector.broadcast %22 : vector<1x32xf32> to vector<16x32xf32>
    %24 = arith.addf %21, %23 : vector<16x32xf32>
    %25 = arith.truncf %24 : vector<16x32xf32> to vector<16x32xbf16>
    %c0_9 = arith.constant 0 : index
    %c0_10 = arith.constant 0 : index
    %26 = vector.load %arg4[%c0_9, %c0_10] : memref<16x32xbf16, #tpu.memory_space<vmem>>, vector<16x32xbf16>
    tpu.vector_store %arg4[%c0_9, %c0_10], %25 {strides = array<i32>} : memref<16x32xbf16, #tpu.memory_space<vmem>>, vector<16x32xbf16>,
    return
  }
  func.func @transform_0(%arg0: i32) -> (i32, i32) {
    %c0_i32 = arith.constant 0 : i32
    %c0_i32_0 = arith.constant 0 : i32
    return %arg0, %c0_i32 : i32, i32
  }
  func.func @transform_1(%arg0: i32) -> (i32, i32) {
    %c0_i32 = arith.constant 0 : i32
    %c0_i32_0 = arith.constant 0 : i32
    %c0_i32_1 = arith.constant 0 : i32
    return %c0_i32, %c0_i32_0 : i32, i32
  }
  func.func @transform_2(%arg0: i32) -> (i32, i32) {
    %c0_i32 = arith.constant 0 : i32
    %c0_i32_0 = arith.constant 0 : i32
    %c0_i32_1 = arith.constant 0 : i32
    return %c0_i32, %c0_i32_0 : i32, i32
  }
  func.func @transform_3(%arg0: i32) -> (i32, i32) {
    %c0_i32 = arith.constant 0 : i32
    %c0_i32_0 = arith.constant 0 : i32
    return %arg0, %c0_i32 : i32, i32
  }
}

</mosaic_0001>

<bundles_post_ra>
// kernel: tpu_custom_call.1
= control target key start
LH: loop header
LB: loop body
LE: loop exit
PB: predicated region body
PF: predicated region fallthrough
CT: control target
= control target key end

     0   :  { %8 = vsyncpa [#allocation3], 0  ;;  %s229_s0 = inlined_call_operand.hbm [shape: f32[16,32], index: 0, kind: input, shape index: {}]   ;;  %s230_s1 = inlined_call_operand.vmem [shape: f32[1,32], index: 1, kind: input, shape index: {}]   ;;  %s231_s2 = inlined_call_operand.vmem [shape: f32[1,32], index: 2, kind: input, shape index: {}]   ;;  %s232_s3 = inlined_call_operand.hbm [shape: bf16[16,32], index: 3, kind: output, shape index: {}]  }
   0x1   :  { %9 = vsyncpa [#allocation4], 0  ;;  %s169_s12 = smov [#allocation2]   ;;  %s121_s16 = scalar_lea.hbm %s229_s0, 256 }
   0x2   :  { %s15_s13 = sshll.u32 %s169_s12, 4  ;;  %p122_p0 = scmp.ne.s32.totalorder %s229_s0, %s121_s16  ;;  %s16_s13 = int_to_ptr.vmem [resolvable:$true] %s15_s13 }
   0x3   :  { %p125_p1 = scmp.lt.u32.totalorder %s121_s16, %s229_s0 }
   0x5   :  { %p127_p2 = pnand %p125_p1, %p122_p0 }
   0x7   :  { %130 = shalt.err (!%p127_p2)
}
   0x8   :  { %s131_s21 = scalar_lea.vmem %s16_s13, 256  ;;  %p136_p4 = scmp.lt.s32.totalorder %s16_s13, %s16_s13 }
   0x9   :  { %p132_p3 = scmp.ne.s32.totalorder %s16_s13, %s131_s21  ;;  %p137_p5 = scmp.lt.s32.totalorder %s131_s21, %s131_s21 }
   0xb   :  { %p138_p6 = por %p137_p5, %p136_p4 }
   0xd   :  { %p139_p7 = pnand %p138_p6, %p132_p3 }
   0xf   :  { %142 = shalt.err (!%p139_p7)
}
  0x10   :  { %s170_s22 = smov 128   ;;  %s171_s23 = smov 8  }
  0x11   :  { %21 = dma.hbm_to_vmem [thread:$0]  %s229_s0, 256, %s16_s13, [#allocation3], %s170_s22, %s170_s22, %s171_s23  }
  0x12   :  { %165 = dma.done.wait [#allocation3], 256  }
  0x13   :  { %166 = vsyncadd [#allocation3], 4294967040  ;;  %vm31_vm0 = vcmask 261120   ;;  %v29_v0 = vld [vmem:[#allocation2] sm:$0xff]  ;;  %v30_v1 = vld [vmem:[#allocation2 + $0x8] sm:$0xff]  ;;  %vm85_vm1 = vcmask 257024  }
  0x14   :  { %v32_v2 = vsel %vm31_vm0, %v29_v0, 0.0  ;;  %v35_v3 = vsel %vm31_vm0, %v30_v1, 0.0  ;;  %v105_v21 = vld [vmem:[%s230_s1] ss:$0 sm:$0xff]  ;;  %s172_s29 = smov [#allocation5]  }
  0x15   :  { %33 = vadd.xlane.f32.xlu0 %v32_v2  ;;  %v106_v23 = vld [vmem:[%s231_s2] ss:$0 sm:$0xff]  ;;  %s93_s30 = sshll.u32 %s172_s29, 4  ;;  %s94_s30 = int_to_ptr.vmem [resolvable:$true] %s93_s30 }
  0x16   :  { %s143_s1 = scalar_lea.vmem %s94_s30, 128  ;;  %p148_p9 = scmp.lt.s32.totalorder %s94_s30, %s94_s30 }
  0x17   :  { %p144_p8 = scmp.ne.s32.totalorder %s94_s30, %s143_s1  ;;  %p149_p10 = scmp.lt.s32.totalorder %s143_s1, %s143_s1 }
  0x19   :  { %36 = vadd.xlane.f32.xlu0 %v35_v3  ;;  %p150_p11 = por %p149_p10, %p148_p9 }
  0x1b   :  { %p151_p12 = pnand %p150_p11, %p144_p8 }
  0xa2   :  { %v34_v4 = vpop.xlane.xlu0 %33 }
  0xa3   :  { %v39_v5 = vmul.f32 0.03125, %v34_v4 }
  0xa5   :  { %v41_v6 = vsub.f32 %v29_v0, %v39_v5 }
  0xa6   :  { %v37_v7 = vpop.xlane.xlu0 %36 }
  0xa7   :  { %v40_v8 = vmul.f32 0.03125, %v37_v7  ;;  %v43_v9 = vmul.f32 %v41_v6, %v41_v6 }
  0xa9   :  { %v42_v10 = vsub.f32 %v30_v1, %v40_v8  ;;  %v45_v11 = vsel %vm31_vm0, %v43_v9, 0.0 }
  0xaa   :  { %46 = vadd.xlane.f32.xlu1 %v45_v11 }
  0xab   :  { %v44_v12 = vmul.f32 %v42_v10, %v42_v10 }
  0xad   :  { %v48_v13 = vsel %vm31_vm0, %v44_v12, 0.0 }
  0xae   :  { %49 = vadd.xlane.f32.xlu1 %v48_v13 }
 0x137   :  { %v47_v14 = vpop.xlane.xlu1 %46 }
 0x138   :  { %v51_v15 = vmul.f32 0.03125, %v47_v14 }
 0x13a   :  { %v53_v16 = vadd.f32 1e-05, %v51_v15 }
 0x13b   :  { %v50_v17 = vpop.xlane.xlu1 %49 }
 0x13c   :  { %117 = vrsqrt.f32 %v53_v16  ;;  %v52_v18 = vmul.f32 0.03125, %v50_v17 }
 0x13e   :  { %v54_v19 = vadd.f32 1e-05, %v52_v18 }
 0x140   :  { %119 = vrsqrt.f32 %v54_v19 }
 0x146   :  { %v118_v20 = vpop.eup %117 }
 0x147   :  { %v57_v22 = vmul.f32 %v118_v20, %v41_v6 }
 0x149   :  { %v66_v24 = vmul.f32 %v105_v21, %v57_v22 }
 0x14a   :  { %v120_v25 = vpop.eup %119 }
 0x14b   :  { %v58_v26 = vmul.f32 %v120_v25, %v42_v10  ;;  %v75_v27 = vadd.f32 %v106_v23, %v66_v24 }
 0x14d   :  { %v67_v28 = vmul.f32 %v105_v21, %v58_v26  ;;  %v109_v29 = vpack.c.bf16 %v75_v27, %v75_v27 }
 0x14f   :  { %v76_v30 = vadd.f32 %v106_v23, %v67_v28  ;;  %86 = vst.msk [vmem:[#allocation5] sm:$0xf] %vm85_vm1, %v109_v29 }
 0x151   :  { %v110_v31 = vpack.c.bf16 %v76_v30, %v76_v30 }
 0x153   :  { %87 = vst.msk [vmem:[#allocation5 + $0x4] sm:$0xf] %vm85_vm1, %v110_v31 }
 0x154   :  { %154 = shalt.err (!%p151_p12)
}
 0x155   :  { %s155_s5 = scalar_lea.hbm %s232_s3, 128 }
 0x156   :  { %p156_p13 = scmp.ne.s32.totalorder %s232_s3, %s155_s5  ;;  %p159_p0 = scmp.lt.u32.totalorder %s155_s5, %s232_s3 }
 0x158   :  { %p161_p1 = pnand %p159_p0, %p156_p13 }
 0x15a   :  { %164 = shalt.err (!%p161_p1)
}
 0x15b   :  { %s173_s10 = smov 64   ;;  %s174_s11 = smov 4  }
 0x15c   :  { %99 = dma.vmem_to_hbm [thread:$0]  %s94_s30, 128, %s232_s3, [#allocation4], %s173_s10, %s173_s10, %s174_s11  }
 0x15d   :  { %167 = dma.done.wait [#allocation4], 128  }
 0x15e   :  { %168 = vsyncadd [#allocation4], 4294967168 }
 0x15f   :  { %103 = vsyncpa [#allocation3], 1 }
 0x160   :  { %104 = vsyncpa [#allocation4], 1 }

</bundles_post_ra>
